<compile_context>
chip_gen: v5e
topology: v5e:2x2
jax: 0.10.0
libtpu: 0.0.40
codegen_flags: <defaults>
</compile_context>

<pallas_src>
import functools
import math

import jax
import jax.numpy as jnp
from jax.experimental import pallas as pl
from jax.experimental.pallas import tpu as pltpu

LANE = 128


def _round_up(n, m):
    return ((n + m - 1) // m) * m


def _activation(name):
    name = name.lower()
    if name == "relu":
        return lambda v: jnp.maximum(v, 0.0)
    if name == "tanh":
        return jnp.tanh
    if name == "sigmoid":
        return jax.nn.sigmoid
    raise ValueError(f"Unsupported activation function: {name}")


def _vmem_capacity_bytes():
    """Physical VMEM per core (generation-aware), conservative fallback."""
    try:
        info = pltpu.get_tpu_info()
        cap = getattr(info, "vmem_capacity_bytes", None)
        if cap:
            return int(cap)
    except Exception:
        pass
    return 64 * 1024 * 1024  # v7x per-TensorCore VMEM (smallest current gen)


def mlp_kernel(*refs, num_layers, activation, mxu_dtype):
    """refs = (x_ref, w1, b1, ..., wL, bL, o_ref).

    Weights arrive already in their MXU dtype (any bf16 cast is done once in
    the wrapper, never per grid step). Bias-add + activation stay in f32.
    """
    act = _activation(activation)
    x_ref = refs[0]
    o_ref = refs[-1]

    h = x_ref[...]
    for l in range(num_layers):
        w_ref = refs[1 + 2 * l]
        b_ref = refs[2 + 2 * l]
        lhs = h if (mxu_dtype is None or h.dtype == mxu_dtype) else h.astype(mxu_dtype)
        h = jnp.dot(lhs, w_ref[...], preferred_element_type=jnp.float32)
        # Activation after EVERY Linear, incl. the last one (matches PyTorch loop).
        h = act(h + b_ref[...])
    o_ref[...] = h.astype(o_ref.dtype)


def base_network_forward(x, params, activation="relu", *,
                         block_batch=None, use_bf16_mxu=None,
                         out_dtype=jnp.float32):
    """Fused MLP forward as one batch-tiled Pallas kernel.

    x:       (batch, input_dim) float32
    params:  dict w1,b1,...,wL,bL  (weights (fan_in, fan_out), biases (1, fan_out))

    use_bf16_mxu=None -> auto: bf16 MXU operands (f32 accumulate) when every
                         contraction is wide enough to be compute-bound
                         (native 918/996 TF/s path on v6e/v7x); narrow nets
                         (like the test below) stay f32 for exact tolerance.
    out_dtype         -> jnp.bfloat16 halves output writeback DMA when the
                         consumer tolerates it.
    """
    num_layers = len(params) // 2
    batch, input_dim = x.shape
    dims_logical = [input_dim] + [params[f"w{l}"].shape[1]
                                  for l in range(1, num_layers + 1)]
    out_dim = dims_logical[-1]

    if use_bf16_mxu is None:
        use_bf16_mxu = min(dims_logical) >= 256
    mxu_dtype = jnp.bfloat16 if use_bf16_mxu else None
    x_dtype = jnp.bfloat16 if use_bf16_mxu else jnp.float32
    x_itemsize = 2 if use_bf16_mxu else 4
    w_itemsize = 2 if use_bf16_mxu else 4
    out_itemsize = jnp.dtype(out_dtype).itemsize
    sub = 16 if use_bf16_mxu else 8           # sublane multiple for packed dtype

    # ---- feature-dim padding -------------------------------------------------
    # Only stored last dims (weight fan_out, bias, output) need lane (128)
    # alignment; the first contraction dim only needs sublane alignment.
    # Intermediate fan_in dims must match the previous layer's padded fan_out.
    in_pad = _round_up(input_dim, sub)
    padded_w, padded_b = [], []
    prev_dim = in_pad
    dims_pad = [in_pad]
    for l in range(1, num_layers + 1):
        w = params[f"w{l}"]
        b = params[f"b{l}"]
        fi, fo = w.shape
        fo_p = _round_up(fo, LANE)
        if (prev_dim, fo_p) != (fi, fo):
            w = jnp.pad(w, ((0, prev_dim - fi), (0, fo_p - fo)))
        if fo_p != fo:
            b = jnp.pad(b, ((0, 0), (0, fo_p - fo)))
        padded_w.append(w.astype(jnp.bfloat16) if use_bf16_mxu else w)
        padded_b.append(b)                     # bias stays f32 (added post-matmul)
        dims_pad.append(fo_p)
        prev_dim = fo_p
    out_pad = dims_pad[-1]
    max_dim = max(dims_pad)

    # TODO(synk): for hidden dims >= ~2048 the fully VMEM-resident weight design
    # stops fitting (notably on v7x's 64 MiB); add an N/K-tiled "arbitrary" grid
    # axis with an f32 VMEM accumulator instead of resident weights.

    # ---- batch tiling ---------------------------------------------------------
    vmem_cap = _vmem_capacity_bytes()
    vmem_ceiling = min(int(0.75 * vmem_cap), 100 * 1024 * 1024)
    if block_batch is None:
        # Bigger tiles amortize per-step overhead on v5e/v6e's 128 MiB VMEM;
        # v7x (64 MiB) gets the smaller cap.
        block_batch = 1024 if vmem_cap >= 96 * 1024 * 1024 else 512

    b8 = _round_up(batch, sub)                 # minimal batch padding
    desired_steps = max(2, pl.cdiv(b8, block_batch))  # >=2 steps => v7x megacore
    tb = min(block_batch, _round_up(pl.cdiv(b8, desired_steps), sub))
    tb = max(tb, sub)

    # Resident params counted double-buffered as worst case; the call below asks
    # Mosaic to single-buffer grid-invariant blocks when supported.
    resident_param_bytes = 2 * sum(int(w.size) * w_itemsize + int(b.size) * 4
                                   for w, b in zip(padded_w, padded_b))

    def vmem_estimate(tb_):
        tile = 2 * tb_ * in_pad * x_itemsize + 2 * tb_ * out_pad * out_itemsize
        live = 3 * tb_ * max_dim * 4           # f32 intermediates + acc headroom
        return tile + resident_param_bytes + live + (2 << 20)

    while vmem_estimate(tb) > vmem_ceiling and tb > sub:
        tb = max(sub, _round_up(tb // 2, sub))

    b_pad = _round_up(b8, tb)
    grid = (b_pad // tb,)
    vmem_bytes = int(min(max(vmem_estimate(tb), 4 << 20), vmem_ceiling))

    # ---- input cast / pad (skipped entirely when a no-op) ---------------------
    x_p = x.astype(x_dtype) if x.dtype != x_dtype else x
    if (b_pad, in_pad) != (batch, input_dim):
        x_p = jnp.pad(x_p, ((0, b_pad - batch), (0, in_pad - input_dim)))

    # ---- cost estimate ---------------------------------------------------------
    flops = 2 * batch * sum(dims_logical[i] * dims_logical[i + 1]
                            for i in range(num_layers))
    transc = 0 if activation.lower() == "relu" else batch * sum(dims_logical[1:])
    bytes_accessed = int(b_pad * in_pad * x_itemsize
                         + sum(int(w.size) * w_itemsize + int(b.size) * 4
                               for w, b in zip(padded_w, padded_b))
                         + b_pad * out_pad * out_itemsize)
    cost = pl.CostEstimate(flops=flops, transcendentals=transc,
                           bytes_accessed=bytes_accessed)

    kernel = functools.partial(mlp_kernel, num_layers=num_layers,
                               activation=activation, mxu_dtype=mxu_dtype)

    def run(single_buffer_weights):
        wkw = {}
        if single_buffer_weights:
            # Grid-invariant weights/biases: double-buffering them only burns VMEM.
            wkw = dict(pipeline_mode=pl.Buffered(1))

        def const_spec(a):
            return pl.BlockSpec(a.shape, lambda i: (0,) * a.ndim, **wkw)

        in_specs = [pl.BlockSpec((tb, in_pad), lambda i: (i, 0))]
        operands = [x_p]
        for w, b in zip(padded_w, padded_b):
            in_specs += [const_spec(w), const_spec(b)]
            operands += [w, b]

        return pl.pallas_call(
            kernel,
            out_shape=jax.ShapeDtypeStruct((b_pad, out_pad), out_dtype),
            grid=grid,
            in_specs=in_specs,
            out_specs=pl.BlockSpec((tb, out_pad), lambda i: (i, 0)),
            compiler_params=pltpu.CompilerParams(
                dimension_semantics=("parallel",),
                vmem_limit_bytes=vmem_bytes),
            cost_estimate=cost,
        )(*operands)

    try:
        out_p = run(single_buffer_weights=True)
    except Exception:
        # pipeline_mode / Buffered support varies across JAX versions; fall back
        # to default (double-buffered) grid-invariant blocks.
        out_p = run(single_buffer_weights=False)

    # Slice off batch / lane padding outside the kernel.
    return out_p[:batch, :out_dim]


def init_params(key, input_dim, output_dim, hidden_dims):
    """Deterministic init mimicking nn.Linear's U(-1/sqrt(fan_in), 1/sqrt(fan_in))."""
    dims = [input_dim] + list(hidden_dims) + [output_dim]
    params = {}
    for i in range(len(dims) - 1):
        fan_in, fan_out = dims[i], dims[i + 1]
        key, kw, kb = jax.random.split(key, 3)
        bound = 1.0 / math.sqrt(fan_in)
        params[f"w{i+1}"] = jax.random.uniform(
            kw, (fan_in, fan_out), jnp.float32, -bound, bound)
        params[f"b{i+1}"] = jax.random.uniform(
            kb, (1, fan_out), jnp.float32, -bound, bound)
    return params


def reference_forward(x, params, activation="relu"):
    act = _activation(activation)
    num_layers = len(params) // 2
    h = x
    for l in range(1, num_layers + 1):
        h = act(h @ params[f"w{l}"] + params[f"b{l}"])
    return h


if __name__ == "__main__":
    # Shapes consistent with the module defaults:
    # input_dim=32, hidden_dims=[64, 64], output_dim=16.
    # TODO(synk): Dropout (dropout>0), save/load and get_parameters are
    # host-side / training-time features with no kernel equivalent (default
    # dropout=0.0 means this forward pass is complete).
    input_dim, output_dim, hidden_dims = 32, 16, [64, 64]

    key = jax.random.PRNGKey(0)
    key, kx1, kx2 = jax.random.split(key, 3)
    params = init_params(key, input_dim, output_dim, hidden_dims)
    x_small = jax.random.normal(kx1, (8, input_dim), jnp.float32)    # single grid step
    x_multi = jax.random.normal(kx2, (64, input_dim), jnp.float32)   # multi-step grid

    # f32 MXU path (exact tolerance) for every supported activation.
    for act_name in ("relu", "tanh", "sigmoid"):
        for x in (x_small, x_multi):
            out = jax.block_until_ready(
                base_network_forward(x, params, activation=act_name,
                                     use_bf16_mxu=False))
            ref = reference_forward(x, params, activation=act_name)
            assert out.shape == ref.shape
            assert jnp.allclose(out, ref, atol=1e-5, rtol=1e-5), act_name

    # bf16 MXU path (native MXU on v6e/v7x); looser tolerance is expected.
    out = jax.block_until_ready(
        base_network_forward(x_multi, params, activation="relu",
                             use_bf16_mxu=True))
    ref = reference_forward(x_multi, params, activation="relu")
    assert jnp.allclose(out, ref, atol=5e-2, rtol=5e-2)

    print("KERNEL_OK")
</pallas_src>

<mosaic_0001>
module attributes {stable_mosaic.version = 11 : i64} {
  func.func @mlp_kernel(%arg0: i32, %arg1: memref<8x32xf32, #tpu.memory_space<vmem>>, %arg2: memref<32x128xf32, #tpu.memory_space<vmem>>, %arg3: memref<1x128xf32, #tpu.memory_space<vmem>>, %arg4: memref<128x128xf32, #tpu.memory_space<vmem>>, %arg5: memref<1x128xf32, #tpu.memory_space<vmem>>, %arg6: memref<128x128xf32, #tpu.memory_space<vmem>>, %arg7: memref<1x128xf32, #tpu.memory_space<vmem>>, %arg8: memref<8x128xf32, #tpu.memory_space<vmem>>) attributes {dimension_semantics = [#tpu.dimension_semantics<parallel>], iteration_bounds = array<i64: 1>, scalar_prefetch = 0 : i64, scratch_operands = 0 : i64, tpu.core_type = #tpu.core_type<tc>, window_params = [{transform_indices = @transform_0, window_bounds = array<i64: 8, 32>}, {pipeline_mode = #tpu.pipeline_mode<synchronous>, transform_indices = @transform_1, window_bounds = array<i64: 32, 128>}, {pipeline_mode = #tpu.pipeline_mode<synchronous>, transform_indices = @transform_2, window_bounds = array<i64: 1, 128>}, {pipeline_mode = #tpu.pipeline_mode<synchronous>, transform_indices = @transform_3, window_bounds = array<i64: 128, 128>}, {pipeline_mode = #tpu.pipeline_mode<synchronous>, transform_indices = @transform_4, window_bounds = array<i64: 1, 128>}, {pipeline_mode = #tpu.pipeline_mode<synchronous>, transform_indices = @transform_5, window_bounds = array<i64: 128, 128>}, {pipeline_mode = #tpu.pipeline_mode<synchronous>, transform_indices = @transform_6, window_bounds = array<i64: 1, 128>}, {transform_indices = @transform_7, window_bounds = array<i64: 8, 128>}]} {
    %c0 = arith.constant 0 : index
    %c0_0 = arith.constant 0 : index
    %0 = vector.load %arg1[%c0, %c0_0] : memref<8x32xf32, #tpu.memory_space<vmem>>, vector<8x32xf32>
    %c0_1 = arith.constant 0 : index
    %c0_2 = arith.constant 0 : index
    %1 = vector.load %arg2[%c0_1, %c0_2] : memref<32x128xf32, #tpu.memory_space<vmem>>, vector<32x128xf32>
    %cst = arith.constant dense<0.000000e+00> : vector<8x128xf32>
    %2 = tpu.matmul %0, %1, %cst {dimension_numbers = #tpu.dot_dimension_numbers<[1], [0], [0], [1], [0, 0, 1, 1], [], []>} : vector<8x32xf32>, vector<32x128xf32>, vector<8x128xf32> -> vector<8x128xf32>
    %c0_3 = arith.constant 0 : index
    %c0_4 = arith.constant 0 : index
    %3 = vector.load %arg3[%c0_3, %c0_4] : memref<1x128xf32, #tpu.memory_space<vmem>>, vector<1x128xf32>
    %4 = vector.broadcast %3 : vector<1x128xf32> to vector<8x128xf32>
    %5 = arith.addf %2, %4 : vector<8x128xf32>
    %cst_5 = arith.constant 0.000000e+00 : f32
    %6 = vector.broadcast %cst_5 : f32 to vector<8x128xf32>
    %7 = arith.maximumf %5, %6 : vector<8x128xf32>
    %c0_6 = arith.constant 0 : index
    %c0_7 = arith.constant 0 : index
    %8 = vector.load %arg4[%c0_6, %c0_7] : memref<128x128xf32, #tpu.memory_space<vmem>>, vector<128x128xf32>
    %cst_8 = arith.constant dense<0.000000e+00> : vector<8x128xf32>
    %9 = tpu.matmul %7, %8, %cst_8 {dimension_numbers = #tpu.dot_dimension_numbers<[1], [0], [0], [1], [0, 0, 1, 1], [], []>} : vector<8x128xf32>, vector<128x128xf32>, vector<8x128xf32> -> vector<8x128xf32>
    %c0_9 = arith.constant 0 : index
    %c0_10 = arith.constant 0 : index
    %10 = vector.load %arg5[%c0_9, %c0_10] : memref<1x128xf32, #tpu.memory_space<vmem>>, vector<1x128xf32>
    %11 = vector.broadcast %10 : vector<1x128xf32> to vector<8x128xf32>
    %12 = arith.addf %9, %11 : vector<8x128xf32>
    %cst_11 = arith.constant 0.000000e+00 : f32
    %13 = vector.broadcast %cst_11 : f32 to vector<8x128xf32>
    %14 = arith.maximumf %12, %13 : vector<8x128xf32>
    %c0_12 = arith.constant 0 : index
    %c0_13 = arith.constant 0 : index
    %15 = vector.load %arg6[%c0_12, %c0_13] : memref<128x128xf32, #tpu.memory_space<vmem>>, vector<128x128xf32>
    %cst_14 = arith.constant dense<0.000000e+00> : vector<8x128xf32>
    %16 = tpu.matmul %14, %15, %cst_14 {dimension_numbers = #tpu.dot_dimension_numbers<[1], [0], [0], [1], [0, 0, 1, 1], [], []>} : vector<8x128xf32>, vector<128x128xf32>, vector<8x128xf32> -> vector<8x128xf32>
    %c0_15 = arith.constant 0 : index
    %c0_16 = arith.constant 0 : index
    %17 = vector.load %arg7[%c0_15, %c0_16] : memref<1x128xf32, #tpu.memory_space<vmem>>, vector<1x128xf32>
    %18 = vector.broadcast %17 : vector<1x128xf32> to vector<8x128xf32>
    %19 = arith.addf %16, %18 : vector<8x128xf32>
    %cst_17 = arith.constant 0.000000e+00 : f32
    %20 = vector.broadcast %cst_17 : f32 to vector<8x128xf32>
    %21 = arith.maximumf %19, %20 : vector<8x128xf32>
    %c0_18 = arith.constant 0 : index
    %c0_19 = arith.constant 0 : index
    %22 = vector.load %arg8[%c0_18, %c0_19] : memref<8x128xf32, #tpu.memory_space<vmem>>, vector<8x128xf32>
    tpu.vector_store %arg8[%c0_18, %c0_19], %21 {strides = array<i32>} : memref<8x128xf32, #tpu.memory_space<vmem>>, vector<8x128xf32>,
    return
  }
  func.func @transform_0(%arg0: i32) -> (i32, i32) {
    %c0_i32 = arith.constant 0 : i32
    %c0_i32_0 = arith.constant 0 : i32
    return %arg0, %c0_i32 : i32, i32
  }
  func.func @transform_1(%arg0: i32) -> (i32, i32) {
    %c0_i32 = arith.constant 0 : i32
    %c0_i32_0 = arith.constant 0 : i32
    %c0_i32_1 = arith.constant 0 : i32
    return %c0_i32, %c0_i32_0 : i32, i32
  }
  func.func @transform_2(%arg0: i32) -> (i32, i32) {
    %c0_i32 = arith.constant 0 : i32
    %c0_i32_0 = arith.constant 0 : i32
    %c0_i32_1 = arith.constant 0 : i32
    return %c0_i32, %c0_i32_0 : i32, i32
  }
  func.func @transform_3(%arg0: i32) -> (i32, i32) {
    %c0_i32 = arith.constant 0 : i32
    %c0_i32_0 = arith.constant 0 : i32
    %c0_i32_1 = arith.constant 0 : i32
    return %c0_i32, %c0_i32_0 : i32, i32
  }
  func.func @transform_4(%arg0: i32) -> (i32, i32) {
    %c0_i32 = arith.constant 0 : i32
    %c0_i32_0 = arith.constant 0 : i32
    %c0_i32_1 = arith.constant 0 : i32
    return %c0_i32, %c0_i32_0 : i32, i32
  }
  func.func @transform_5(%arg0: i32) -> (i32, i32) {
    %c0_i32 = arith.constant 0 : i32
    %c0_i32_0 = arith.constant 0 : i32
    %c0_i32_1 = arith.constant 0 : i32
    return %c0_i32, %c0_i32_0 : i32, i32
  }
  func.func @transform_6(%arg0: i32) -> (i32, i32) {
    %c0_i32 = arith.constant 0 : i32
    %c0_i32_0 = arith.constant 0 : i32
    %c0_i32_1 = arith.constant 0 : i32
    return %c0_i32, %c0_i32_0 : i32, i32
  }
  func.func @transform_7(%arg0: i32) -> (i32, i32) {
    %c0_i32 = arith.constant 0 : i32
    %c0_i32_0 = arith.constant 0 : i32
    return %arg0, %c0_i32 : i32, i32
  }
}

module attributes {stable_mosaic.version = 11 : i64} {
  func.func @mlp_kernel(%arg0: i32, %arg1: memref<8x32xf32, #tpu.memory_space<vmem>>, %arg2: memref<32x128xf32, #tpu.memory_space<vmem>>, %arg3: memref<1x128xf32, #tpu.memory_space<vmem>>, %arg4: memref<128x128xf32, #tpu.memory_space<vmem>>, %arg5: memref<1x128xf32, #tpu.memory_space<vmem>>, %arg6: memref<128x128xf32, #tpu.memory_space<vmem>>, %arg7: memref<1x128xf32, #tpu.memory_space<vmem>>, %arg8: memref<8x128xf32, #tpu.memory_space<vmem>>) attributes {dimension_semantics = [#tpu.dimension_semantics<parallel>], iteration_bounds = array<i64: 1>, scalar_prefetch = 0 : i64, scratch_operands = 0 : i64, tpu.core_type = #tpu.core_type<tc>, window_params = [{transform_indices = @transform_0, window_bounds = array<i64: 8, 32>}, {pipeline_mode = #tpu.pipeline_mode<synchronous>, transform_indices = @transform_1, window_bounds = array<i64: 32, 128>}, {pipeline_mode = #tpu.pipeline_mode<synchronous>, transform_indices = @transform_2, window_bounds = array<i64: 1, 128>}, {pipeline_mode = #tpu.pipeline_mode<synchronous>, transform_indices = @transform_3, window_bounds = array<i64: 128, 128>}, {pipeline_mode = #tpu.pipeline_mode<synchronous>, transform_indices = @transform_4, window_bounds = array<i64: 1, 128>}, {pipeline_mode = #tpu.pipeline_mode<synchronous>, transform_indices = @transform_5, window_bounds = array<i64: 128, 128>}, {pipeline_mode = #tpu.pipeline_mode<synchronous>, transform_indices = @transform_6, window_bounds = array<i64: 1, 128>}, {transform_indices = @transform_7, window_bounds = array<i64: 8, 128>}]} {
    %c0 = arith.constant 0 : index
    %c0_0 = arith.constant 0 : index
    %0 = vector.load %arg1[%c0, %c0_0] : memref<8x32xf32, #tpu.memory_space<vmem>>, vector<8x32xf32>
    %c0_1 = arith.constant 0 : index
    %c0_2 = arith.constant 0 : index
    %1 = vector.load %arg2[%c0_1, %c0_2] : memref<32x128xf32, #tpu.memory_space<vmem>>, vector<32x128xf32>
    %cst = arith.constant dense<0.000000e+00> : vector<8x128xf32>
    %2 = tpu.matmul %0, %1, %cst {dimension_numbers = #tpu.dot_dimension_numbers<[1], [0], [0], [1], [0, 0, 1, 1], [], []>} : vector<8x32xf32>, vector<32x128xf32>, vector<8x128xf32> -> vector<8x128xf32>
    %c0_3 = arith.constant 0 : index
    %c0_4 = arith.constant 0 : index
    %3 = vector.load %arg3[%c0_3, %c0_4] : memref<1x128xf32, #tpu.memory_space<vmem>>, vector<1x128xf32>
    %4 = vector.broadcast %3 : vector<1x128xf32> to vector<8x128xf32>
    %5 = arith.addf %2, %4 : vector<8x128xf32>
    %cst_5 = arith.constant 0.000000e+00 : f32
    %6 = vector.broadcast %cst_5 : f32 to vector<8x128xf32>
    %7 = arith.maximumf %5, %6 : vector<8x128xf32>
    %c0_6 = arith.constant 0 : index
    %c0_7 = arith.constant 0 : index
    %8 = vector.load %arg4[%c0_6, %c0_7] : memref<128x128xf32, #tpu.memory_space<vmem>>, vector<128x128xf32>
    %cst_8 = arith.constant dense<0.000000e+00> : vector<8x128xf32>
    %9 = tpu.matmul %7, %8, %cst_8 {dimension_numbers = #tpu.dot_dimension_numbers<[1], [0], [0], [1], [0, 0, 1, 1], [], []>} : vector<8x128xf32>, vector<128x128xf32>, vector<8x128xf32> -> vector<8x128xf32>
    %c0_9 = arith.constant 0 : index
    %c0_10 = arith.constant 0 : index
    %10 = vector.load %arg5[%c0_9, %c0_10] : memref<1x128xf32, #tpu.memory_space<vmem>>, vector<1x128xf32>
    %11 = vector.broadcast %10 : vector<1x128xf32> to vector<8x128xf32>
    %12 = arith.addf %9, %11 : vector<8x128xf32>
    %cst_11 = arith.constant 0.000000e+00 : f32
    %13 = vector.broadcast %cst_11 : f32 to vector<8x128xf32>
    %14 = arith.maximumf %12, %13 : vector<8x128xf32>
    %c0_12 = arith.constant 0 : index
    %c0_13 = arith.constant 0 : index
    %15 = vector.load %arg6[%c0_12, %c0_13] : memref<128x128xf32, #tpu.memory_space<vmem>>, vector<128x128xf32>
    %cst_14 = arith.constant dense<0.000000e+00> : vector<8x128xf32>
    %16 = tpu.matmul %14, %15, %cst_14 {dimension_numbers = #tpu.dot_dimension_numbers<[1], [0], [0], [1], [0, 0, 1, 1], [], []>} : vector<8x128xf32>, vector<128x128xf32>, vector<8x128xf32> -> vector<8x128xf32>
    %c0_15 = arith.constant 0 : index
    %c0_16 = arith.constant 0 : index
    %17 = vector.load %arg7[%c0_15, %c0_16] : memref<1x128xf32, #tpu.memory_space<vmem>>, vector<1x128xf32>
    %18 = vector.broadcast %17 : vector<1x128xf32> to vector<8x128xf32>
    %19 = arith.addf %16, %18 : vector<8x128xf32>
    %cst_17 = arith.constant 0.000000e+00 : f32
    %20 = vector.broadcast %cst_17 : f32 to vector<8x128xf32>
    %21 = arith.maximumf %19, %20 : vector<8x128xf32>
    %c0_18 = arith.constant 0 : index
    %c0_19 = arith.constant 0 : index
    %22 = vector.load %arg8[%c0_18, %c0_19] : memref<8x128xf32, #tpu.memory_space<vmem>>, vector<8x128xf32>
    tpu.vector_store %arg8[%c0_18, %c0_19], %21 {strides = array<i32>} : memref<8x128xf32, #tpu.memory_space<vmem>>, vector<8x128xf32>,
    return
  }
  func.func @transform_0(%arg0: i32) -> (i32, i32) {
    %c0_i32 = arith.constant 0 : i32
    %c0_i32_0 = arith.constant 0 : i32
    return %arg0, %c0_i32 : i32, i32
  }
  func.func @transform_1(%arg0: i32) -> (i32, i32) {
    %c0_i32 = arith.constant 0 : i32
    %c0_i32_0 = arith.constant 0 : i32
    %c0_i32_1 = arith.constant 0 : i32
    return %c0_i32, %c0_i32_0 : i32, i32
  }
  func.func @transform_2(%arg0: i32) -> (i32, i32) {
    %c0_i32 = arith.constant 0 : i32
    %c0_i32_0 = arith.constant 0 : i32
    %c0_i32_1 = arith.constant 0 : i32
    return %c0_i32, %c0_i32_0 : i32, i32
  }
  func.func @transform_3(%arg0: i32) -> (i32, i32) {
    %c0_i32 = arith.constant 0 : i32
    %c0_i32_0 = arith.constant 0 : i32
    %c0_i32_1 = arith.constant 0 : i32
    return %c0_i32, %c0_i32_0 : i32, i32
  }
  func.func @transform_4(%arg0: i32) -> (i32, i32) {
    %c0_i32 = arith.constant 0 : i32
    %c0_i32_0 = arith.constant 0 : i32
    %c0_i32_1 = arith.constant 0 : i32
    return %c0_i32, %c0_i32_0 : i32, i32
  }
  func.func @transform_5(%arg0: i32) -> (i32, i32) {
    %c0_i32 = arith.constant 0 : i32
    %c0_i32_0 = arith.constant 0 : i32
    %c0_i32_1 = arith.constant 0 : i32
    return %c0_i32, %c0_i32_0 : i32, i32
  }
  func.func @transform_6(%arg0: i32) -> (i32, i32) {
    %c0_i32 = arith.constant 0 : i32
    %c0_i32_0 = arith.constant 0 : i32
    %c0_i32_1 = arith.constant 0 : i32
    return %c0_i32, %c0_i32_0 : i32, i32
  }
  func.func @transform_7(%arg0: i32) -> (i32, i32) {
    %c0_i32 = arith.constant 0 : i32
    %c0_i32_0 = arith.constant 0 : i32
    return %arg0, %c0_i32 : i32, i32
  }
}

</mosaic_0001>

<bundles_post_ra>
// kernel: tpu_custom_call.1
= control target key start
LH: loop header
LB: loop body
LE: loop exit
PB: predicated region body
PF: predicated region fallthrough
CT: control target
= control target key end

     0   :  { %12 = vsyncpa [#allocation3], 0  ;;  %s434_s0 = inlined_call_operand.hbm [shape: f32[8,32], index: 0, kind: input, shape index: {}]   ;;  %s435_s1 = inlined_call_operand.hbm [shape: f32[32,128], index: 1, kind: input, shape index: {}]   ;;  %s436_s2 = inlined_call_operand.vmem [shape: f32[1,128], index: 2, kind: input, shape index: {}]   ;;  %s437_s3 = inlined_call_operand.hbm [shape: f32[128,128], index: 3, kind: input, shape index: {}]   ;;  %s438_s4 = inlined_call_operand.vmem [shape: f32[1,128], index: 4, kind: input, shape index: {}]   ;;  %s439_s5 = inlined_call_operand.hbm [shape: f32[128,128], index: 5, kind: input, shape index: {}]   ;;  %s440_s6 = inlined_call_operand.vmem [shape: f32[1,128], index: 6, kind: input, shape index: {}]   ;;  %s441_s7 = inlined_call_operand.hbm [shape: f32[8,128], index: 7, kind: output, shape index: {}]  }
   0x1   :  { %13 = vsyncpa [#allocation6], 0 }
   0x2   :  { %14 = vsyncpa [#allocation9], 0  ;;  %s31_s26 = sshll.u32 %s435_s1, 4  ;;  %s32_s26 = int_to_ptr.hbm [resolvable:$true] %s31_s26 }
   0x3   :  { %15 = vsyncpa [#allocation4], 0  ;;  %s363_s27 = smov [#allocation5]   ;;  %s21_s8 = sshll.u32 %s434_s0, 4  ;;  %s22_s8 = int_to_ptr.hbm [resolvable:$true] %s21_s8 }
   0x4   :  { %s33_s28 = sshll.u32 %s363_s27, 4  ;;  %s364_s9 = smov 128   ;;  %s34_s28 = int_to_ptr.vmem [resolvable:$true] %s33_s28 }
   0x5   :  { %s365_s10 = smov 8   ;;  %s366_s11 = smov [#allocation2]  }
   0x6   :  { %39 = dma.hbm_to_vmem [thread:$0]  %s32_s26, 512, %s34_s28, [#allocation6], %s364_s9, %s364_s9, %s365_s10  }
   0x7   :  { %s23_s12 = sshll.u32 %s366_s11, 4  ;;  %s46_s15 = sshll.u32 %s437_s3, 4  ;;  %s24_s12 = int_to_ptr.vmem [resolvable:$true] %s23_s12  ;;  %s47_s15 = int_to_ptr.hbm [resolvable:$true] %s46_s15 }
   0x8   :  { %26 = dma.hbm_to_vmem [thread:$0]  %s22_s8, 128, %s24_s12, [#allocation3]  }
   0x9   :  { %s61_s17 = sshll.u32 %s439_s5, 4  ;;  %s367_s18 = smov [#allocation7]   ;;  %s62_s17 = int_to_ptr.hbm [resolvable:$true] %s61_s17 }
   0xa   :  { %s48_s19 = sshll.u32 %s367_s18, 4  ;;  %s368_s0 = smov [#allocation8]   ;;  %s49_s19 = int_to_ptr.vmem [resolvable:$true] %s48_s19 }
   0xb   :  { %54 = dma.hbm_to_vmem [thread:$0]  %s47_s15, 2048, %s49_s19, [#allocation6], %s364_s9, %s364_s9, %s365_s10  }
   0xc   :  { %s63_s20 = sshll.u32 %s368_s0, 4  ;;  %s64_s20 = int_to_ptr.vmem [resolvable:$true] %s63_s20 }
   0xd   :  { %69 = dma.hbm_to_vmem [thread:$0]  %s62_s17, 2048, %s64_s20, [#allocation9], %s364_s9, %s364_s9, %s365_s10  }
   0xe   :  { %355 = dma.done.wait [#allocation3], 128  }
   0xf   :  { %356 = vsyncadd [#allocation3], 4294967168 }
  0x10   :  { %357 = dma.done.wait [#allocation6], 2560  }
  0x11   :  { %358 = vsyncadd [#allocation6], 4294964736 }
  0x12   :  { %359 = dma.done.wait [#allocation9], 2048  }
  0x13   :  { %360 = vsyncadd [#allocation9], 4294965248  ;;  %v92_v0 = vld [vmem:[#allocation5 + $0x18] sm:$0xff]  ;;  %v91_v1 = vld [vmem:[#allocation5 + $0x10] sm:$0xff]  ;;  %vm97_vm0 = vcmask 261120   ;;  %s369_s24 = smov [#allocation10]  }
  0x14   :  { %113 = vmatpush.msra.mxu0 %v92_v0  ;;  %v137_v2 = vld [vmem:[#allocation7 + $0x78] sm:$0xff]  ;;  %v90_v3 = vld [vmem:[#allocation5 + $0x8] sm:$0xff]  ;;  %v136_v4 = vld [vmem:[#allocation7 + $0x70] sm:$0xff]  ;;  %s210_s25 = sshll.u32 %s369_s24, 4  ;;  %s212_s28 = sshll.u32 %s441_s7, 4  ;;  %s211_s25 = int_to_ptr.vmem [resolvable:$true] %s210_s25  ;;  %s213_s28 = int_to_ptr.hbm [resolvable:$true] %s212_s28 }
  0x15   :  { %142 = vmatpush.msra.mxu1 %v137_v2  ;;  %v135_v5 = vld [vmem:[#allocation7 + $0x68] sm:$0xff]  ;;  %v89_v6 = vld [vmem:[#allocation5] sm:$0xff]  ;;  %v88_v7 = vld [vmem:[#allocation2] sm:$0xff] }
  0x16   :  { %114 = vmatpush.msra.mxu0 %v91_v1  ;;  %v134_v8 = vld [vmem:[#allocation7 + $0x60] sm:$0xff]  ;;  %v133_v9 = vld [vmem:[#allocation7 + $0x58] sm:$0xff]  ;;  %v132_v10 = vld [vmem:[#allocation7 + $0x50] sm:$0xff] }
  0x17   :  { %143 = vmatpush.msra.mxu1 %v136_v4  ;;  %v131_v11 = vld [vmem:[#allocation7 + $0x48] sm:$0xff]  ;;  %v130_v12 = vld [vmem:[#allocation7 + $0x40] sm:$0xff]  ;;  %v129_v13 = vld [vmem:[#allocation7 + $0x38] sm:$0xff] }
  0x18   :  { %115 = vmatpush.msra.mxu0 %v90_v3  ;;  %v128_v14 = vld [vmem:[#allocation7 + $0x30] sm:$0xff]  ;;  %v127_v15 = vld [vmem:[#allocation7 + $0x28] sm:$0xff]  ;;  %v126_v16 = vld [vmem:[#allocation7 + $0x20] sm:$0xff] }
  0x19   :  { %144 = vmatpush.msra.mxu1 %v135_v5  ;;  %v125_v17 = vld [vmem:[#allocation7 + $0x18] sm:$0xff]  ;;  %v124_v18 = vld [vmem:[#allocation7 + $0x10] sm:$0xff]  ;;  %v123_v19 = vld [vmem:[#allocation7 + $0x8] sm:$0xff] }
  0x1a   :  { %116 = vmatpush.msra.mxu0 %v89_v6  ;;  %v122_v20 = vld [vmem:[#allocation7] sm:$0xff]  ;;  %v178_v21 = vld [vmem:[#allocation8 + $0x78] sm:$0xff]  ;;  %v177_v22 = vld [vmem:[#allocation8 + $0x70] sm:$0xff] }
  0x1b   :  { %224 = vmatmul.msk.f32.vlgmr.msra.gmra.mxu0 %vm97_vm0, %v88_v7  ;;  %145 = vmatpush.msra.mxu1 %v134_v8  ;;  %v176_v23 = vld [vmem:[#allocation8 + $0x68] sm:$0xff]  ;;  %v175_v24 = vld [vmem:[#allocation8 + $0x60] sm:$0xff]  ;;  %v174_v25 = vld [vmem:[#allocation8 + $0x58] sm:$0xff] }
  0x1c   :  { %183 = vmatpush.msra.mxu2 %v178_v21  ;;  %v173_v26 = vld [vmem:[#allocation8 + $0x50] sm:$0xff]  ;;  %v172_v27 = vld [vmem:[#allocation8 + $0x48] sm:$0xff]  ;;  %v171_v28 = vld [vmem:[#allocation8 + $0x40] sm:$0xff] }
  0x1d   :  { %146 = vmatpush.msra.mxu1 %v133_v9  ;;  %v170_v29 = vld [vmem:[#allocation8 + $0x38] sm:$0xff]  ;;  %v169_v30 = vld [vmem:[#allocation8 + $0x30] sm:$0xff]  ;;  %v168_v31 = vld [vmem:[#allocation8 + $0x28] sm:$0xff] }
  0x1e   :  { %184 = vmatpush.msra.mxu2 %v177_v22  ;;  %v167_v32 = vld [vmem:[#allocation8 + $0x20] sm:$0xff]  ;;  %v166_v33 = vld [vmem:[#allocation8 + $0x18] sm:$0xff]  ;;  %v165_v38 = vld [vmem:[#allocation8 + $0x10] sm:$0xff] }
  0x1f   :  { %147 = vmatpush.msra.mxu1 %v132_v10  ;;  %v232_v34 = vld [vmem:[%s436_s2] ss:$0 sm:$0xff]  ;;  %v164_v39 = vld [vmem:[#allocation8 + $0x8] sm:$0xff]  ;;  %v163_v40 = vld [vmem:[#allocation8] sm:$0xff] }
  0x20   :  { %185 = vmatpush.msra.mxu2 %v176_v23  ;;  %v233_v41 = vld [vmem:[%s438_s4] ss:$0 sm:$0xff] }
  0x21   :  { %148 = vmatpush.msra.mxu1 %v131_v11  ;;  %v234_v45 = vld [vmem:[%s440_s6] ss:$0 sm:$0xff] }
  0x22   :  { %186 = vmatpush.msra.mxu2 %v175_v24 }
  0x23   :  { %149 = vmatpush.msra.mxu1 %v130_v12 }
  0x24   :  { %187 = vmatpush.msra.mxu2 %v174_v25 }
  0x25   :  { %150 = vmatpush.msra.mxu1 %v129_v13 }
  0x26   :  { %188 = vmatpush.msra.mxu2 %v173_v26 }
  0x27   :  { %151 = vmatpush.msra.mxu1 %v128_v14 }
  0x28   :  { %189 = vmatpush.msra.mxu2 %v172_v27 }
  0x29   :  { %152 = vmatpush.msra.mxu1 %v127_v15 }
  0x2a   :  { %190 = vmatpush.msra.mxu2 %v171_v28 }
  0x2b   :  { %153 = vmatpush.msra.mxu1 %v126_v16 }
  0x2c   :  { %191 = vmatpush.msra.mxu2 %v170_v29 }
  0x2d   :  { %154 = vmatpush.msra.mxu1 %v125_v17 }
  0x2e   :  { %192 = vmatpush.msra.mxu2 %v169_v30 }
  0x2f   :  { %155 = vmatpush.msra.mxu1 %v124_v18 }
  0x30   :  { %193 = vmatpush.msra.mxu2 %v168_v31 }
  0x31   :  { %156 = vmatpush.msra.mxu1 %v123_v19 }
  0x32   :  { %194 = vmatpush.msra.mxu2 %v167_v32 }
  0x33   :  { %157 = vmatpush.msra.mxu1 %v122_v20 }
  0x34   :  { %195 = vmatpush.msra.mxu2 %v166_v33 }
  0x36   :  { %196 = vmatpush.msra.mxu2 %v165_v38 }
  0x38   :  { %197 = vmatpush.msra.mxu2 %v164_v39 }
  0x3a   :  { %198 = vmatpush.msra.mxu2 %v163_v40 }
  0x98   :  { %v118_v35 = vpop.f32.mrf.mxu0 }
  0x99   :  { %v119_v36 = vadd.f32 %v232_v34, %v118_v35 }
  0x9b   :  { %v121_v37 = vmax.f32 %v119_v36, 0.0 }
  0x9d   :  { %158 = vmatmul.f32.vlgmr.msra.gmra.mxu1 %v121_v37 }
 0x11a   :  { %v159_v42 = vpop.f32.mrf.mxu1 }
 0x11b   :  { %v160_v43 = vadd.f32 %v233_v41, %v159_v42 }
 0x11d   :  { %v162_v44 = vmax.f32 %v160_v43, 0.0 }
 0x11f   :  { %199 = vmatmul.f32.vlgmr.msra.gmra.mxu2 %v162_v44 }
 0x1a2   :  { %v200_v46 = vpop.f32.mrf.mxu2 }
 0x1a3   :  { %v201_v47 = vadd.f32 %v234_v45, %v200_v46 }
 0x1a5   :  { %v203_v48 = vmax.f32 %v201_v47, 0.0 }
 0x1a7   :  { %204 = vst [vmem:[#allocation10] sm:$0xff] %v203_v48 }
 0x1a8   :  { %215 = dma.vmem_to_hbm [thread:$0]  %s211_s25, 128, %s213_s28, [#allocation4]  }
 0x1a9   :  { %361 = dma.done.wait [#allocation4], 128  }
 0x1aa   :  { %362 = vsyncadd [#allocation4], 4294967168 }
 0x1ab   :  { %220 = vsyncpa [#allocation3], 1 }
 0x1ac   :  { %221 = vsyncpa [#allocation6], 1 }
 0x1ad   :  { %222 = vsyncpa [#allocation9], 1 }
 0x1ae   :  { %223 = vsyncpa [#allocation4], 1 }

// kernel: tpu_custom_call.1
= control target key start
LH: loop header
LB: loop body
LE: loop exit
PB: predicated region body
PF: predicated region fallthrough
CT: control target
= control target key end

     0   :  { %12 = vsyncpa [#allocation3], 0  ;;  %s434_s0 = inlined_call_operand.hbm [shape: f32[8,32], index: 0, kind: input, shape index: {}]   ;;  %s435_s1 = inlined_call_operand.hbm [shape: f32[32,128], index: 1, kind: input, shape index: {}]   ;;  %s436_s2 = inlined_call_operand.vmem [shape: f32[1,128], index: 2, kind: input, shape index: {}]   ;;  %s437_s3 = inlined_call_operand.hbm [shape: f32[128,128], index: 3, kind: input, shape index: {}]   ;;  %s438_s4 = inlined_call_operand.vmem [shape: f32[1,128], index: 4, kind: input, shape index: {}]   ;;  %s439_s5 = inlined_call_operand.hbm [shape: f32[128,128], index: 5, kind: input, shape index: {}]   ;;  %s440_s6 = inlined_call_operand.vmem [shape: f32[1,128], index: 6, kind: input, shape index: {}]   ;;  %s441_s7 = inlined_call_operand.hbm [shape: f32[8,128], index: 7, kind: output, shape index: {}]  }
   0x1   :  { %13 = vsyncpa [#allocation6], 0 }
   0x2   :  { %14 = vsyncpa [#allocation9], 0  ;;  %s31_s26 = sshll.u32 %s435_s1, 4  ;;  %s32_s26 = int_to_ptr.hbm [resolvable:$true] %s31_s26 }
   0x3   :  { %15 = vsyncpa [#allocation4], 0  ;;  %s363_s27 = smov [#allocation5]   ;;  %s21_s8 = sshll.u32 %s434_s0, 4  ;;  %s22_s8 = int_to_ptr.hbm [resolvable:$true] %s21_s8 }
   0x4   :  { %s33_s28 = sshll.u32 %s363_s27, 4  ;;  %s364_s9 = smov 128   ;;  %s34_s28 = int_to_ptr.vmem [resolvable:$true] %s33_s28 }
   0x5   :  { %s365_s10 = smov 8   ;;  %s366_s11 = smov [#allocation2]  }
   0x6   :  { %39 = dma.hbm_to_vmem [thread:$0]  %s32_s26, 512, %s34_s28, [#allocation6], %s364_s9, %s364_s9, %s365_s10  }
   0x7   :  { %s23_s12 = sshll.u32 %s366_s11, 4  ;;  %s46_s15 = sshll.u32 %s437_s3, 4  ;;  %s24_s12 = int_to_ptr.vmem [resolvable:$true] %s23_s12  ;;  %s47_s15 = int_to_ptr.hbm [resolvable:$true] %s46_s15 }
   0x8   :  { %26 = dma.hbm_to_vmem [thread:$0]  %s22_s8, 128, %s24_s12, [#allocation3]  }
   0x9   :  { %s61_s17 = sshll.u32 %s439_s5, 4  ;;  %s367_s18 = smov [#allocation7]   ;;  %s62_s17 = int_to_ptr.hbm [resolvable:$true] %s61_s17 }
   0xa   :  { %s48_s19 = sshll.u32 %s367_s18, 4  ;;  %s368_s0 = smov [#allocation8]   ;;  %s49_s19 = int_to_ptr.vmem [resolvable:$true] %s48_s19 }
   0xb   :  { %54 = dma.hbm_to_vmem [thread:$0]  %s47_s15, 2048, %s49_s19, [#allocation6], %s364_s9, %s364_s9, %s365_s10  }
   0xc   :  { %s63_s20 = sshll.u32 %s368_s0, 4  ;;  %s64_s20 = int_to_ptr.vmem [resolvable:$true] %s63_s20 }
   0xd   :  { %69 = dma.hbm_to_vmem [thread:$0]  %s62_s17, 2048, %s64_s20, [#allocation9], %s364_s9, %s364_s9, %s365_s10  }
   0xe   :  { %355 = dma.done.wait [#allocation3], 128  }
   0xf   :  { %356 = vsyncadd [#allocation3], 4294967168 }
  0x10   :  { %357 = dma.done.wait [#allocation6], 2560  }
  0x11   :  { %358 = vsyncadd [#allocation6], 4294964736 }
  0x12   :  { %359 = dma.done.wait [#allocation9], 2048  }
  0x13   :  { %360 = vsyncadd [#allocation9], 4294965248  ;;  %v92_v0 = vld [vmem:[#allocation5 + $0x18] sm:$0xff]  ;;  %v91_v1 = vld [vmem:[#allocation5 + $0x10] sm:$0xff]  ;;  %vm97_vm0 = vcmask 261120   ;;  %s369_s24 = smov [#allocation10]  }
  0x14   :  { %113 = vmatpush.msra.mxu0 %v92_v0  ;;  %v137_v2 = vld [vmem:[#allocation7 + $0x78] sm:$0xff]  ;;  %v90_v3 = vld [vmem:[#allocation5 + $0x8] sm:$0xff]  ;;  %v136_v4 = vld [vmem:[#allocation7 + $0x70] sm:$0xff]  ;;  %s210_s25 = sshll.u32 %s369_s24, 4  ;;  %s212_s28 = sshll.u32 %s441_s7, 4  ;;  %s211_s25 = int_to_ptr.vmem [resolvable:$true] %s210_s25  ;;  %s213_s28 = int_to_ptr.hbm [resolvable:$true] %s212_s28 }
  0x15   :  { %142 = vmatpush.msra.mxu1 %v137_v2  ;;  %v135_v5 = vld [vmem:[#allocation7 + $0x68] sm:$0xff]  ;;  %v89_v6 = vld [vmem:[#allocation5] sm:$0xff]  ;;  %v88_v7 = vld [vmem:[#allocation2] sm:$0xff] }
  0x16   :  { %114 = vmatpush.msra.mxu0 %v91_v1  ;;  %v134_v8 = vld [vmem:[#allocation7 + $0x60] sm:$0xff]  ;;  %v133_v9 = vld [vmem:[#allocation7 + $0x58] sm:$0xff]  ;;  %v132_v10 = vld [vmem:[#allocation7 + $0x50] sm:$0xff] }
  0x17   :  { %143 = vmatpush.msra.mxu1 %v136_v4  ;;  %v131_v11 = vld [vmem:[#allocation7 + $0x48] sm:$0xff]  ;;  %v130_v12 = vld [vmem:[#allocation7 + $0x40] sm:$0xff]  ;;  %v129_v13 = vld [vmem:[#allocation7 + $0x38] sm:$0xff] }
  0x18   :  { %115 = vmatpush.msra.mxu0 %v90_v3  ;;  %v128_v14 = vld [vmem:[#allocation7 + $0x30] sm:$0xff]  ;;  %v127_v15 = vld [vmem:[#allocation7 + $0x28] sm:$0xff]  ;;  %v126_v16 = vld [vmem:[#allocation7 + $0x20] sm:$0xff] }
  0x19   :  { %144 = vmatpush.msra.mxu1 %v135_v5  ;;  %v125_v17 = vld [vmem:[#allocation7 + $0x18] sm:$0xff]  ;;  %v124_v18 = vld [vmem:[#allocation7 + $0x10] sm:$0xff]  ;;  %v123_v19 = vld [vmem:[#allocation7 + $0x8] sm:$0xff] }
  0x1a   :  { %116 = vmatpush.msra.mxu0 %v89_v6  ;;  %v122_v20 = vld [vmem:[#allocation7] sm:$0xff]  ;;  %v178_v21 = vld [vmem:[#allocation8 + $0x78] sm:$0xff]  ;;  %v177_v22 = vld [vmem:[#allocation8 + $0x70] sm:$0xff] }
  0x1b   :  { %224 = vmatmul.msk.f32.vlgmr.msra.gmra.mxu0 %vm97_vm0, %v88_v7  ;;  %145 = vmatpush.msra.mxu1 %v134_v8  ;;  %v176_v23 = vld [vmem:[#allocation8 + $0x68] sm:$0xff]  ;;  %v175_v24 = vld [vmem:[#allocation8 + $0x60] sm:$0xff]  ;;  %v174_v25 = vld [vmem:[#allocation8 + $0x58] sm:$0xff] }
  0x1c   :  { %183 = vmatpush.msra.mxu2 %v178_v21  ;;  %v173_v26 = vld [vmem:[#allocation8 + $0x50] sm:$0xff]  ;;  %v172_v27 = vld [vmem:[#allocation8 + $0x48] sm:$0xff]  ;;  %v171_v28 = vld [vmem:[#allocation8 + $0x40] sm:$0xff] }
  0x1d   :  { %146 = vmatpush.msra.mxu1 %v133_v9  ;;  %v170_v29 = vld [vmem:[#allocation8 + $0x38] sm:$0xff]  ;;  %v169_v30 = vld [vmem:[#allocation8 + $0x30] sm:$0xff]  ;;  %v168_v31 = vld [vmem:[#allocation8 + $0x28] sm:$0xff] }
  0x1e   :  { %184 = vmatpush.msra.mxu2 %v177_v22  ;;  %v167_v32 = vld [vmem:[#allocation8 + $0x20] sm:$0xff]  ;;  %v166_v33 = vld [vmem:[#allocation8 + $0x18] sm:$0xff]  ;;  %v165_v38 = vld [vmem:[#allocation8 + $0x10] sm:$0xff] }
  0x1f   :  { %147 = vmatpush.msra.mxu1 %v132_v10  ;;  %v232_v34 = vld [vmem:[%s436_s2] ss:$0 sm:$0xff]  ;;  %v164_v39 = vld [vmem:[#allocation8 + $0x8] sm:$0xff]  ;;  %v163_v40 = vld [vmem:[#allocation8] sm:$0xff] }
  0x20   :  { %185 = vmatpush.msra.mxu2 %v176_v23  ;;  %v233_v41 = vld [vmem:[%s438_s4] ss:$0 sm:$0xff] }
  0x21   :  { %148 = vmatpush.msra.mxu1 %v131_v11  ;;  %v234_v45 = vld [vmem:[%s440_s6] ss:$0 sm:$0xff] }
  0x22   :  { %186 = vmatpush.msra.mxu2 %v175_v24 }
  0x23   :  { %149 = vmatpush.msra.mxu1 %v130_v12 }
  0x24   :  { %187 = vmatpush.msra.mxu2 %v174_v25 }
  0x25   :  { %150 = vmatpush.msra.mxu1 %v129_v13 }
  0x26   :  { %188 = vmatpush.msra.mxu2 %v173_v26 }
  0x27   :  { %151 = vmatpush.msra.mxu1 %v128_v14 }
  0x28   :  { %189 = vmatpush.msra.mxu2 %v172_v27 }
  0x29   :  { %152 = vmatpush.msra.mxu1 %v127_v15 }
  0x2a   :  { %190 = vmatpush.msra.mxu2 %v171_v28 }
  0x2b   :  { %153 = vmatpush.msra.mxu1 %v126_v16 }
  0x2c   :  { %191 = vmatpush.msra.mxu2 %v170_v29 }
  0x2d   :  { %154 = vmatpush.msra.mxu1 %v125_v17 }
  0x2e   :  { %192 = vmatpush.msra.mxu2 %v169_v30 }
  0x2f   :  { %155 = vmatpush.msra.mxu1 %v124_v18 }
  0x30   :  { %193 = vmatpush.msra.mxu2 %v168_v31 }
  0x31   :  { %156 = vmatpush.msra.mxu1 %v123_v19 }
  0x32   :  { %194 = vmatpush.msra.mxu2 %v167_v32 }
  0x33   :  { %157 = vmatpush.msra.mxu1 %v122_v20 }
  0x34   :  { %195 = vmatpush.msra.mxu2 %v166_v33 }
  0x36   :  { %196 = vmatpush.msra.mxu2 %v165_v38 }
  0x38   :  { %197 = vmatpush.msra.mxu2 %v164_v39 }
  0x3a   :  { %198 = vmatpush.msra.mxu2 %v163_v40 }
  0x98   :  { %v118_v35 = vpop.f32.mrf.mxu0 }
  0x99   :  { %v119_v36 = vadd.f32 %v232_v34, %v118_v35 }
  0x9b   :  { %v121_v37 = vmax.f32 %v119_v36, 0.0 }
  0x9d   :  { %158 = vmatmul.f32.vlgmr.msra.gmra.mxu1 %v121_v37 }
 0x11a   :  { %v159_v42 = vpop.f32.mrf.mxu1 }
 0x11b   :  { %v160_v43 = vadd.f32 %v233_v41, %v159_v42 }
 0x11d   :  { %v162_v44 = vmax.f32 %v160_v43, 0.0 }
 0x11f   :  { %199 = vmatmul.f32.vlgmr.msra.gmra.mxu2 %v162_v44 }
 0x1a2   :  { %v200_v46 = vpop.f32.mrf.mxu2 }
 0x1a3   :  { %v201_v47 = vadd.f32 %v234_v45, %v200_v46 }
 0x1a5   :  { %v203_v48 = vmax.f32 %v201_v47, 0.0 }
 0x1a7   :  { %204 = vst [vmem:[#allocation10] sm:$0xff] %v203_v48 }
 0x1a8   :  { %215 = dma.vmem_to_hbm [thread:$0]  %s211_s25, 128, %s213_s28, [#allocation4]  }
 0x1a9   :  { %361 = dma.done.wait [#allocation4], 128  }
 0x1aa   :  { %362 = vsyncadd [#allocation4], 4294967168 }
 0x1ab   :  { %220 = vsyncpa [#allocation3], 1 }
 0x1ac   :  { %221 = vsyncpa [#allocation6], 1 }
 0x1ad   :  { %222 = vsyncpa [#allocation9], 1 }
 0x1ae   :  { %223 = vsyncpa [#allocation4], 1 }

</bundles_post_ra>
